<compile_context>
chip_gen: v6e
topology: v6e:2x2x1
jax: 0.10.0
libtpu: 0.0.40
codegen_flags: <defaults>
</compile_context>

<pallas_src>
import jax
import jax.numpy as jnp
from jax.experimental import pallas as pl
from jax.experimental.pallas import tpu as pltpu


# ---------------------------------------------------------------------------
# Kernels (x arrives f32, is cast to bf16 in-kernel; f32 MXU accumulation)
# ---------------------------------------------------------------------------
def _dpp_kernel_noalpha(x_ref, w_dpp_ref, b_dpp_ref, w_out_ref, b_out_ref,
                        out_ref):
    # In-kernel bf16 cast of x: VPU work that hides under the MXU.
    x = x_ref[...].astype(w_dpp_ref.dtype)
    # dpp_layer1: affine map on the MXU (bf16 in, f32 accumulate).
    pre = jnp.dot(x, w_dpp_ref[...],
                  preferred_element_type=jnp.float32) + b_dpp_ref[...]
    # relu1 (VPU), downcast to bf16 for the second MXU pass.
    hidden = jnp.maximum(pre, 0.0).astype(w_out_ref.dtype)
    # fc_out: Linear(hidden_size_dpp, output_size).
    out_ref[...] = (jnp.dot(hidden, w_out_ref[...],
                            preferred_element_type=jnp.float32)
                    + b_out_ref[...]).astype(out_ref.dtype)


def _dpp_kernel_alpha(x_ref, w_dpp_ref, b_dpp_ref, w_out_ref, b_out_ref,
                      out_ref, alpha_ref):
    x = x_ref[...].astype(w_dpp_ref.dtype)
    pre = jnp.dot(x, w_dpp_ref[...],
                  preferred_element_type=jnp.float32) + b_dpp_ref[...]
    # alphas = sigmoid(pre-activation); EUP, off the MXU critical path.
    alpha_ref[...] = jax.nn.sigmoid(pre).astype(alpha_ref.dtype)
    hidden = jnp.maximum(pre, 0.0).astype(w_out_ref.dtype)
    out_ref[...] = (jnp.dot(hidden, w_out_ref[...],
                            preferred_element_type=jnp.float32)
                    + b_out_ref[...]).astype(out_ref.dtype)


# ---------------------------------------------------------------------------
# Helpers
# ---------------------------------------------------------------------------
def _round_up(x, m):
    return ((x + m - 1) // m) * m


def _cdiv(a, b):
    return (a + b - 1) // b


def _pad_to(a, shape):
    pads = [(0, s - d) for s, d in zip(shape, a.shape)]
    if any(p[1] for p in pads):
        return jnp.pad(a, pads)
    return a


def _tpu_vmem_and_mxu():
    """Physical VMEM bytes per core and MXU tile width (128 or 256)."""
    vmem_cap = 64 * 1024 * 1024          # conservative default (v7x)
    mxu = 128                            # safe default (v5e 4x128^2)
    try:
        vmem_cap = int(pltpu.get_tpu_info().vmem_capacity_bytes)
    except Exception:
        pass
    try:
        kind = jax.devices()[0].device_kind.lower()
        if ("v6" in kind) or ("v7" in kind):
            mxu = 256                    # v6e/v7x: 2x256^2 MXU
    except Exception:
        pass
    return vmem_cap, mxu


# ---------------------------------------------------------------------------
# Model factory: pads/casts weights ONCE, returns a per-call forward().
# ---------------------------------------------------------------------------
def make_dpp_forward(w_dpp, b_dpp, w_out, b_out,
                     out_dtype=jnp.float32, alpha_dtype=jnp.float32):
    """Build a fused forward for DPPModelBase.

    w_dpp: [D_in, H]   dpp_layer1 weight (stored [in, out])
    b_dpp: [1, H]/[H]  dpp_layer1 bias
    w_out: [H, O]      fc_out weight (stored [in, out])
    b_out: [1, O]/[O]  fc_out bias
    out_dtype / alpha_dtype: set to jnp.bfloat16 to halve output HBM writeback
    if downstream tolerates it (defaults keep f32 module semantics).
    """
    D, H = w_dpp.shape
    O = w_out.shape[1]
    vmem_cap, mxu = _tpu_vmem_and_mxu()

    def _align(d):
        a = mxu if d >= mxu else 128     # 256-align large dims on v6e/v7x
        return _round_up(d, a)

    # Lane-dense padded widths; zero padding is numerically exact
    # (padded pre-activation is 0, relu(0)=0, padded w_out rows are 0).
    Dp = _round_up(D, 128)
    Hp = _align(H)
    Op = _align(O)

    # Weight/bias pad + bf16 cast hoisted out of the per-call hot path.
    wd = _pad_to(w_dpp, (Dp, Hp)).astype(jnp.bfloat16)
    bd = _pad_to(jnp.asarray(b_dpp).reshape(1, -1), (1, Hp)).astype(jnp.float32)
    wo = _pad_to(w_out, (Hp, Op)).astype(jnp.bfloat16)
    bo = _pad_to(jnp.asarray(b_out).reshape(1, -1), (1, Op)).astype(jnp.float32)

    out_bytes = jnp.dtype(out_dtype).itemsize
    alpha_bytes = jnp.dtype(alpha_dtype).itemsize
    # Count weights x2 (buffer-conservative); biases small.
    weight_bytes = 2 * (wd.size * 2 + wo.size * 2 + bd.size * 4 + bo.size * 4)

    def _footprint(tb, with_alpha):
        x_tiles = 3 * tb * Dp * 4                       # up to 3-deep buffering
        out_tiles = 2 * tb * Op * out_bytes
        alpha_tiles = (2 * tb * Hp * alpha_bytes) if with_alpha else 0
        temps = tb * Hp * 4 + tb * Hp * 2 + tb * Op * 4  # pre f32, hidden bf16, acc
        return weight_bytes + x_tiles + out_tiles + alpha_tiles + temps

    vmem_budget = int(0.7 * vmem_cap)

    def _choose_tb(B, with_alpha):
        if B <= 128:
            tb = _round_up(B, 8)                        # single small tile
        else:
            # Aim for >=4 (>=8 for very large B) grid steps so DMA pipelines
            # and v7x megacore has work per core; cap at 512 rows.
            target_steps = 8 if B >= 2048 else 4
            tb = min(512, max(128, _round_up(_cdiv(B, target_steps), 8)))
        # Shrink until the per-step footprint fits the VMEM budget.
        while tb > 8 and _footprint(tb, with_alpha) > vmem_budget:
            tb = max(8, _round_up(tb // 2, 8))
        return tb

    def forward(x, return_alpha_flag=False):
        B = x.shape[0]
        TB = _choose_tb(B, return_alpha_flag)
        Bp = _round_up(B, TB)
        num_steps = Bp // TB

        # x stays f32 on the wire; bf16 cast happens inside the kernel.
        xb = _pad_to(x.astype(jnp.float32), (Bp, Dp))

        x_spec_kwargs = {}
        if num_steps >= 3:
            # Extra buffer on the (small) x tile hides input DMA when per-tile
            # compute is short.
            x_spec_kwargs["pipeline_mode"] = pl.Buffered(3)
        in_specs = [
            pl.BlockSpec((TB, Dp), lambda i: (i, 0), **x_spec_kwargs),
            pl.BlockSpec((Dp, Hp), lambda i: (0, 0)),   # weights VMEM-resident
            pl.BlockSpec((1, Hp), lambda i: (0, 0)),
            pl.BlockSpec((Hp, Op), lambda i: (0, 0)),
            pl.BlockSpec((1, Op), lambda i: (0, 0)),
        ]
        out_spec = pl.BlockSpec((TB, Op), lambda i: (i, 0))
        alpha_spec = pl.BlockSpec((TB, Hp), lambda i: (i, 0))

        footprint = _footprint(TB, return_alpha_flag)
        vmem_limit = int(min(0.9 * vmem_cap,
                             max(footprint * 1.25, 16 * 1024 * 1024)))
        compiler_params = pltpu.CompilerParams(
            dimension_semantics=("parallel",),          # megacore on v7x
            vmem_limit_bytes=vmem_limit,
        )

        flops = 2 * Bp * (Dp * Hp + Hp * Op)
        bytes_io = (xb.size * 4 + wd.size * 2 + wo.size * 2
                    + bd.size * 4 + bo.size * 4 + Bp * Op * out_bytes
                    + (Bp * Hp * alpha_bytes if return_alpha_flag else 0))
        cost = pl.CostEstimate(
            flops=flops,
            transcendentals=(Bp * Hp if return_alpha_flag else 0),
            bytes_accessed=bytes_io,
        )

        if return_alpha_flag:
            out, alphas = pl.pallas_call(
                _dpp_kernel_alpha,
                out_shape=(
                    jax.ShapeDtypeStruct((Bp, Op), out_dtype),
                    jax.ShapeDtypeStruct((Bp, Hp), alpha_dtype),
                ),
                grid=(num_steps,),
                in_specs=in_specs,
                out_specs=(out_spec, alpha_spec),
                compiler_params=compiler_params,
                cost_estimate=cost,
            )(xb, wd, bd, wo, bo)
            return out[:B, :O], alphas[:B, :H]

        out = pl.pallas_call(
            _dpp_kernel_noalpha,
            out_shape=jax.ShapeDtypeStruct((Bp, Op), out_dtype),
            grid=(num_steps,),
            in_specs=in_specs,
            out_specs=out_spec,
            compiler_params=compiler_params,
            cost_estimate=cost,
        )(xb, wd, bd, wo, bo)
        return out[:B, :O]

    return forward


# ---------------------------------------------------------------------------
# Reference (mirrors the kernel's bf16-input / f32-accumulate numerics)
# ---------------------------------------------------------------------------
def reference_forward(x, w_dpp, b_dpp, w_out, b_out):
    xb = x.astype(jnp.bfloat16)
    wd = w_dpp.astype(jnp.bfloat16)
    wo = w_out.astype(jnp.bfloat16)
    pre = jnp.dot(xb, wd, preferred_element_type=jnp.float32) + b_dpp
    alphas = jax.nn.sigmoid(pre)
    hidden = jnp.maximum(pre, 0.0).astype(jnp.bfloat16)
    out = jnp.dot(hidden, wo, preferred_element_type=jnp.float32) + b_out
    return out, alphas


if __name__ == "__main__":
    # Small shapes consistent with the module: batch=8, input=32,
    # hidden_size_dpp=32, output_size=16.
    B, D_IN, H, O = 8, 32, 32, 16

    key = jax.random.PRNGKey(0)
    kx, kw1, kb1, kw2, kb2 = jax.random.split(key, 5)

    x = jax.random.normal(kx, (B, D_IN), dtype=jnp.float32)
    # dpp_layer parameters (affine), stored [in, out]; biases kept 2D [1, out].
    w_dpp = jax.random.normal(kw1, (D_IN, H), dtype=jnp.float32) * 0.1
    b_dpp = jax.random.normal(kb1, (1, H), dtype=jnp.float32) * 0.1
    # fc_out parameters: Linear(hidden_size_dpp, output_size).
    w_out = jax.random.normal(kw2, (H, O), dtype=jnp.float32) * 0.1
    b_out = jax.random.normal(kb2, (1, O), dtype=jnp.float32) * 0.1

    # Weight prep (pad + bf16 cast) happens ONCE here, not per call.
    forward = make_dpp_forward(w_dpp, b_dpp, w_out, b_out)
    fwd = jax.jit(forward, static_argnames=("return_alpha_flag",))

    # Path 1: return_alpha_flag=True (out + alphas).
    out_a, alphas = fwd(x, return_alpha_flag=True)
    # Path 2: return_alpha_flag=False (lane-dense output only, no alpha I/O).
    out_n = fwd(x, return_alpha_flag=False)
    jax.block_until_ready((out_a, alphas, out_n))

    ref_out, ref_alphas = reference_forward(x, w_dpp, b_dpp, w_out, b_out)
    assert out_a.shape == (B, O) and alphas.shape == (B, H)
    assert out_n.shape == (B, O)
    assert jnp.allclose(out_a, ref_out, atol=1e-3, rtol=1e-3)
    assert jnp.allclose(out_n, ref_out, atol=1e-3, rtol=1e-3)
    assert jnp.allclose(alphas, ref_alphas, atol=1e-3, rtol=1e-3)

    print("KERNEL_OK")
</pallas_src>

<mosaic_0001>
module attributes {stable_mosaic.version = 11 : i64} {
  func.func @_dpp_kernel_alpha(%arg0: i32, %arg1: memref<8x128xf32, #tpu.memory_space<vmem>>, %arg2: memref<128x128xbf16, #tpu.memory_space<vmem>>, %arg3: memref<1x128xf32, #tpu.memory_space<vmem>>, %arg4: memref<128x128xbf16, #tpu.memory_space<vmem>>, %arg5: memref<1x128xf32, #tpu.memory_space<vmem>>, %arg6: memref<8x128xf32, #tpu.memory_space<vmem>>, %arg7: memref<8x128xf32, #tpu.memory_space<vmem>>) attributes {dimension_semantics = [#tpu.dimension_semantics<parallel>], iteration_bounds = array<i64: 1>, scalar_prefetch = 0 : i64, scratch_operands = 0 : i64, tpu.core_type = #tpu.core_type<tc>, window_params = [{transform_indices = @transform_0, window_bounds = array<i64: 8, 128>}, {pipeline_mode = #tpu.pipeline_mode<synchronous>, transform_indices = @transform_1, window_bounds = array<i64: 128, 128>}, {pipeline_mode = #tpu.pipeline_mode<synchronous>, transform_indices = @transform_2, window_bounds = array<i64: 1, 128>}, {pipeline_mode = #tpu.pipeline_mode<synchronous>, transform_indices = @transform_3, window_bounds = array<i64: 128, 128>}, {pipeline_mode = #tpu.pipeline_mode<synchronous>, transform_indices = @transform_4, window_bounds = array<i64: 1, 128>}, {transform_indices = @transform_5, window_bounds = array<i64: 8, 128>}, {transform_indices = @transform_6, window_bounds = array<i64: 8, 128>}]} {
    %c0 = arith.constant 0 : index
    %c0_0 = arith.constant 0 : index
    %0 = vector.load %arg1[%c0, %c0_0] : memref<8x128xf32, #tpu.memory_space<vmem>>, vector<8x128xf32>
    %1 = arith.truncf %0 : vector<8x128xf32> to vector<8x128xbf16>
    %c0_1 = arith.constant 0 : index
    %c0_2 = arith.constant 0 : index
    %2 = vector.load %arg2[%c0_1, %c0_2] : memref<128x128xbf16, #tpu.memory_space<vmem>>, vector<128x128xbf16>
    %cst = arith.constant dense<0.000000e+00> : vector<8x128xf32>
    %3 = tpu.matmul %1, %2, %cst {dimension_numbers = #tpu.dot_dimension_numbers<[1], [0], [0], [1], [0, 0, 1, 1], [], []>} : vector<8x128xbf16>, vector<128x128xbf16>, vector<8x128xf32> -> vector<8x128xf32>
    %c0_3 = arith.constant 0 : index
    %c0_4 = arith.constant 0 : index
    %4 = vector.load %arg3[%c0_3, %c0_4] : memref<1x128xf32, #tpu.memory_space<vmem>>, vector<1x128xf32>
    %5 = vector.broadcast %4 : vector<1x128xf32> to vector<8x128xf32>
    %6 = arith.addf %3, %5 : vector<8x128xf32>
    %7 = arith.negf %6 : vector<8x128xf32>
    %8 = math.exp %7 : vector<8x128xf32>
    %cst_5 = arith.constant 1.000000e+00 : f32
    %9 = vector.broadcast %cst_5 : f32 to vector<8x128xf32>
    %10 = arith.addf %9, %8 : vector<8x128xf32>
    %11 = arith.divf %9, %10 : vector<8x128xf32>
    %c0_6 = arith.constant 0 : index
    %c0_7 = arith.constant 0 : index
    %12 = vector.load %arg7[%c0_6, %c0_7] : memref<8x128xf32, #tpu.memory_space<vmem>>, vector<8x128xf32>
    tpu.vector_store %arg7[%c0_6, %c0_7], %11 {strides = array<i32>} : memref<8x128xf32, #tpu.memory_space<vmem>>, vector<8x128xf32>,
    %cst_8 = arith.constant 0.000000e+00 : f32
    %13 = vector.broadcast %cst_8 : f32 to vector<8x128xf32>
    %14 = arith.maximumf %6, %13 : vector<8x128xf32>
    %15 = arith.truncf %14 : vector<8x128xf32> to vector<8x128xbf16>
    %c0_9 = arith.constant 0 : index
    %c0_10 = arith.constant 0 : index
    %16 = vector.load %arg4[%c0_9, %c0_10] : memref<128x128xbf16, #tpu.memory_space<vmem>>, vector<128x128xbf16>
    %cst_11 = arith.constant dense<0.000000e+00> : vector<8x128xf32>
    %17 = tpu.matmul %15, %16, %cst_11 {dimension_numbers = #tpu.dot_dimension_numbers<[1], [0], [0], [1], [0, 0, 1, 1], [], []>} : vector<8x128xbf16>, vector<128x128xbf16>, vector<8x128xf32> -> vector<8x128xf32>
    %c0_12 = arith.constant 0 : index
    %c0_13 = arith.constant 0 : index
    %18 = vector.load %arg5[%c0_12, %c0_13] : memref<1x128xf32, #tpu.memory_space<vmem>>, vector<1x128xf32>
    %19 = vector.broadcast %18 : vector<1x128xf32> to vector<8x128xf32>
    %20 = arith.addf %17, %19 : vector<8x128xf32>
    %c0_14 = arith.constant 0 : index
    %c0_15 = arith.constant 0 : index
    %21 = vector.load %arg6[%c0_14, %c0_15] : memref<8x128xf32, #tpu.memory_space<vmem>>, vector<8x128xf32>
    tpu.vector_store %arg6[%c0_14, %c0_15], %20 {strides = array<i32>} : memref<8x128xf32, #tpu.memory_space<vmem>>, vector<8x128xf32>,
    return
  }
  func.func @transform_0(%arg0: i32) -> (i32, i32) {
    %c0_i32 = arith.constant 0 : i32
    %c0_i32_0 = arith.constant 0 : i32
    return %arg0, %c0_i32 : i32, i32
  }
  func.func @transform_1(%arg0: i32) -> (i32, i32) {
    %c0_i32 = arith.constant 0 : i32
    %c0_i32_0 = arith.constant 0 : i32
    %c0_i32_1 = arith.constant 0 : i32
    return %c0_i32, %c0_i32_0 : i32, i32
  }
  func.func @transform_2(%arg0: i32) -> (i32, i32) {
    %c0_i32 = arith.constant 0 : i32
    %c0_i32_0 = arith.constant 0 : i32
    %c0_i32_1 = arith.constant 0 : i32
    return %c0_i32, %c0_i32_0 : i32, i32
  }
  func.func @transform_3(%arg0: i32) -> (i32, i32) {
    %c0_i32 = arith.constant 0 : i32
    %c0_i32_0 = arith.constant 0 : i32
    %c0_i32_1 = arith.constant 0 : i32
    return %c0_i32, %c0_i32_0 : i32, i32
  }
  func.func @transform_4(%arg0: i32) -> (i32, i32) {
    %c0_i32 = arith.constant 0 : i32
    %c0_i32_0 = arith.constant 0 : i32
    %c0_i32_1 = arith.constant 0 : i32
    return %c0_i32, %c0_i32_0 : i32, i32
  }
  func.func @transform_5(%arg0: i32) -> (i32, i32) {
    %c0_i32 = arith.constant 0 : i32
    %c0_i32_0 = arith.constant 0 : i32
    return %arg0, %c0_i32 : i32, i32
  }
  func.func @transform_6(%arg0: i32) -> (i32, i32) {
    %c0_i32 = arith.constant 0 : i32
    %c0_i32_0 = arith.constant 0 : i32
    return %arg0, %c0_i32 : i32, i32
  }
}

</mosaic_0001>

<bundles_post_ra>
// kernel: forward.1
= control target key start
LH: loop header
LB: loop body
LE: loop exit
PB: predicated region body
PF: predicated region fallthrough
CT: control target
= control target key end

     0   :  { %12 = vsyncpa [#allocation3], 0  ;;  %s574_s0 = inlined_call_operand.vmem [shape: f32[8,128], index: 0, kind: input, shape index: {}]   ;;  %s575_s1 = inlined_call_operand.hbm [shape: bf16[128,128], index: 1, kind: input, shape index: {}]   ;;  %s576_s2 = inlined_call_operand.vmem [shape: f32[1,128], index: 2, kind: input, shape index: {}]   ;;  %s577_s3 = inlined_call_operand.hbm [shape: bf16[128,128], index: 3, kind: input, shape index: {}]   ;;  %s578_s4 = inlined_call_operand.vmem [shape: f32[1,128], index: 4, kind: input, shape index: {}]   ;;  %s579_s5 = inlined_call_operand.hbm [shape: f32[8,128], index: 5, kind: output, shape index: {0}]   ;;  %s580_s6 = inlined_call_operand.hbm [shape: f32[8,128], index: 6, kind: output, shape index: {1}]  }
   0x1   :  { %13 = vsyncpa [#allocation6], 0 }
   0x2   :  { %14 = vsyncpa [#allocation4], 0 }
   0x3   :  { %15 = vsyncpa [#allocation9], 0  ;;  %s510_s21 = smov [#allocation2]  }
   0x4   :  { %s23_s22 = sshll.u32 %s510_s21, 4  ;;  %s24_s22 = int_to_ptr.vmem [resolvable:$true] %s23_s22 }
   0x5   :  { %s430_s23 = scalar_lea.vmem %s24_s22, 1024  ;;  %p435_p1 = scmp.lt.s32.totalorder %s24_s22, %s24_s22 }
   0x6   :  { %p431_p0 = scmp.ne.s32.totalorder %s24_s22, %s430_s23  ;;  %p436_p2 = scmp.lt.s32.totalorder %s430_s23, %s430_s23 }
   0x8   :  { %p437_p3 = por %p436_p2, %p435_p1 }
   0xa   :  { %p438_p4 = pnand %p437_p3, %p431_p0 }
   0xc   :  { %441 = shalt.err (!%p438_p4)
}
   0xd   :  { %s511_s24 = smov 64   ;;  %s512_s25 = smov 4  }
   0xe   :  { %29 = dma.hbm_to_vmem [thread:$0]  %s575_s1, 1024, %s24_s22, [#allocation3], %s511_s24, %s511_s24, %s512_s25  }
   0xf   :  { %s513_s28 = smov [#allocation5]  }
  0x10   :  { %s37_s29 = sshll.u32 %s513_s28, 4  ;;  %s38_s29 = int_to_ptr.vmem [resolvable:$true] %s37_s29 }
  0x11   :  { %s450_s30 = scalar_lea.vmem %s38_s29, 1024  ;;  %p455_p6 = scmp.lt.s32.totalorder %s38_s29, %s38_s29 }
  0x12   :  { %p451_p5 = scmp.ne.s32.totalorder %s38_s29, %s450_s30  ;;  %p456_p7 = scmp.lt.s32.totalorder %s450_s30, %s450_s30 }
  0x14   :  { %p457_p8 = por %p456_p7, %p455_p6 }
  0x16   :  { %p458_p9 = pnand %p457_p8, %p451_p5 }
  0x18   :  { %461 = shalt.err (!%p458_p9)
}
  0x19   :  { %43 = dma.hbm_to_vmem [thread:$0]  %s577_s3, 1024, %s38_s29, [#allocation6], %s511_s24, %s511_s24, %s512_s25  }
  0x1a   :  { %502 = dma.done.wait [#allocation3], 1024  }
  0x1b   :  { %503 = vsyncadd [#allocation3], 4294966272 }
  0x1c   :  { %504 = dma.done.wait [#allocation6], 1024  }
  0x1d   :  { %505 = vsyncadd [#allocation6], 4294966272  ;;  %v514_v0 = vmov 0.0   ;;  %vm515_vm0 = vmmov 0   ;;  %v402_v1 = vld [vmem:[#allocation2 + $0x38] sm:$0xff]   ;;  %v403_v2 = vld [vmem:[#allocation2 + $0x30] sm:$0xff]  }
  0x1e   :  { %354 = vmatprep.subr.bf16.mxu0 %v514_v0  ;;  %370 = vmatprep.mubr.msk.bf16.mxu0 %vm515_vm0, %v514_v0  ;;  %v404_v3 = vld [vmem:[#allocation2 + $0x28] sm:$0xff]   ;;  %v410_v4 = vld [vmem:[#allocation5 + $0x38] sm:$0xff]   ;;  %v405_v5 = vld [vmem:[#allocation2 + $0x20] sm:$0xff]  }
  0x1f   :  { %374 = vmatprep.subr.bf16.mxu1 %v514_v0  ;;  %390 = vmatprep.mubr.msk.bf16.mxu1 %vm515_vm0, %v514_v0  ;;  %v411_v6 = vld [vmem:[#allocation5 + $0x30] sm:$0xff]   ;;  %v406_v7 = vld [vmem:[#allocation2 + $0x18] sm:$0xff]   ;;  %v412_v8 = vld [vmem:[#allocation5 + $0x28] sm:$0xff]  }
  0x20   :  { %355 = vmatpush3.bf16.msra.mxu0 %v402_v1  ;;  %375 = vmatpush3.bf16.msra.mxu1 %v410_v4  ;;  %v407_v9 = vld [vmem:[#allocation2 + $0x10] sm:$0xff]   ;;  %v413_v10 = vld [vmem:[#allocation5 + $0x20] sm:$0xff]   ;;  %v408_v11 = vld [vmem:[#allocation2 + $0x8] sm:$0xff]  }
  0x21   :  { %356 = vmatprep.subr.bf16.mxu0 %v514_v0  ;;  %376 = vmatprep.subr.bf16.mxu1 %v514_v0  ;;  %v414_v12 = vld [vmem:[#allocation5 + $0x18] sm:$0xff]   ;;  %v409_v13 = vld [vmem:[#allocation2] sm:$0xff]   ;;  %v415_v15 = vld [vmem:[#allocation5 + $0x10] sm:$0xff]  }
  0x22   :  { %v53_v14 = vld [vmem:[%s574_s0] sm:$0xff]  ;;  %v416_v17 = vld [vmem:[#allocation5 + $0x8] sm:$0xff]   ;;  %s516_s0 = smov [#allocation8]  }
  0x23   :  { %v54_v16 = vpack.c.bf16 %v53_v14, %v53_v14  ;;  %v417_v18 = vld [vmem:[#allocation5] sm:$0xff]   ;;  %s303_s11 = sshll.u32 %s516_s0, 4  ;;  %s304_s11 = int_to_ptr.vmem [resolvable:$true] %s303_s11 }
  0x24   :  { %357 = vmatpush3.bf16.msra.mxu0 %v403_v2  ;;  %377 = vmatpush3.bf16.msra.mxu1 %v411_v6  ;;  %v317_v19 = vld [vmem:[%s576_s2] ss:$0 sm:$0xff]  ;;  %s462_s12 = scalar_lea.vmem %s304_s11, 128  ;;  %p467_p11 = scmp.lt.s32.totalorder %s304_s11, %s304_s11 }
  0x25   :  { %358 = vmatprep.subr.bf16.mxu0 %v514_v0  ;;  %378 = vmatprep.subr.bf16.mxu1 %v514_v0  ;;  %p463_p10 = scmp.ne.s32.totalorder %s304_s11, %s462_s12  ;;  %p468_p12 = scmp.lt.s32.totalorder %s462_s12, %s462_s12 }
  0x27   :  { %p469_p13 = por %p468_p12, %p467_p11 }
  0x28   :  { %359 = vmatpush3.bf16.msra.mxu0 %v404_v3  ;;  %379 = vmatpush3.bf16.msra.mxu1 %v412_v8 }
  0x29   :  { %360 = vmatprep.subr.bf16.mxu0 %v514_v0  ;;  %380 = vmatprep.subr.bf16.mxu1 %v514_v0  ;;  %p470_p0 = pnand %p469_p13, %p463_p10 }
  0x2c   :  { %361 = vmatpush3.bf16.msra.mxu0 %v405_v5  ;;  %381 = vmatpush3.bf16.msra.mxu1 %v413_v10 }
  0x2d   :  { %362 = vmatprep.subr.bf16.mxu0 %v514_v0  ;;  %382 = vmatprep.subr.bf16.mxu1 %v514_v0 }
  0x30   :  { %363 = vmatpush3.bf16.msra.mxu0 %v406_v7  ;;  %383 = vmatpush3.bf16.msra.mxu1 %v414_v12 }
  0x31   :  { %364 = vmatprep.subr.bf16.mxu0 %v514_v0  ;;  %384 = vmatprep.subr.bf16.mxu1 %v514_v0 }
  0x34   :  { %365 = vmatpush3.bf16.msra.mxu0 %v407_v9  ;;  %385 = vmatpush3.bf16.msra.mxu1 %v415_v15 }
  0x35   :  { %366 = vmatprep.subr.bf16.mxu0 %v514_v0  ;;  %386 = vmatprep.subr.bf16.mxu1 %v514_v0 }
  0x38   :  { %367 = vmatpush3.bf16.msra.mxu0 %v408_v11  ;;  %387 = vmatpush3.bf16.msra.mxu1 %v416_v17 }
  0x39   :  { %368 = vmatprep.subr.bf16.mxu0 %v514_v0  ;;  %388 = vmatprep.subr.bf16.mxu1 %v514_v0 }
  0x3c   :  { %369 = vmatpush3.bf16.msra.mxu0 %v409_v13  ;;  %389 = vmatpush3.bf16.msra.mxu1 %v417_v18 }
  0x3f   :  { %371 = vmatmul.mubr.bf16.vlgmr.msra.gmra.mxu0 %v54_v16 }
  0xff   :  { %v160_v20 = vpop.f32.mrf.mxu0 }
 0x100   :  { %v161_v21 = vadd.f32 %v317_v19, %v160_v20 }
 0x101   :  { %v372_v22 = vpop.f32.mrf.mxu0 }
 0x102   :  { %v326_v23 = vmul.f32 -1.442695, %v161_v21  ;;  %v173_v24 = vmax.f32 %v161_v21, 0.0 }
 0x103   :  { %v163_v25 = vpop.f32.mrf.mxu0 }
 0x104   :  { %418 = vpow2.f32 %v326_v23  ;;  %v174_v26 = vpack.c.bf16 %v173_v24, %v173_v24 }
 0x105   :  { %v373_v27 = vpop.f32.mrf.mxu0 }
 0x106   :  { %391 = vmatmul.mubr.bf16.vlgmr.msra.gmra.mxu1 %v174_v26 }
 0x111   :  { %v419_v28 = vpop.eup %418 }
 0x112   :  { %v169_v29 = vadd.f32 1.0, %v419_v28 }
 0x114   :  { %420 = vrcp.f32 %v169_v29 }
 0x121   :  { %v421_v30 = vpop.eup %420 }
 0x122   :  { %172 = vst [vmem:[#allocation8] sm:$0xff] %v421_v30 }
 0x123   :  { %473 = shalt.err (!%p470_p0)
}
 0x124   :  { %306 = dma.vmem_to_hbm [thread:$0]  %s304_s11, 128, %s580_s6, [#allocation9]   ;;  %v327_v31 = vld [vmem:[%s578_s4] ss:$0 sm:$0xff] }
 0x125   :  { %s517_s16 = smov [#allocation7]  }
 0x126   :  { %s293_s17 = sshll.u32 %s517_s16, 4  ;;  %s294_s17 = int_to_ptr.vmem [resolvable:$true] %s293_s17 }
 0x127   :  { %s482_s18 = scalar_lea.vmem %s294_s17, 128  ;;  %p487_p2 = scmp.lt.s32.totalorder %s294_s17, %s294_s17 }
 0x128   :  { %p483_p1 = scmp.ne.s32.totalorder %s294_s17, %s482_s18  ;;  %p488_p3 = scmp.lt.s32.totalorder %s482_s18, %s482_s18 }
 0x12a   :  { %p489_p4 = por %p488_p3, %p487_p2 }
 0x12c   :  { %p490_p5 = pnand %p489_p4, %p483_p1 }
 0x1c6   :  { %v280_v32 = vpop.f32.mrf.mxu1 }
 0x1c7   :  { %v281_v33 = vadd.f32 %v327_v31, %v280_v32 }
 0x1c8   :  { %v392_v34 = vpop.f32.mrf.mxu1 }
 0x1c9   :  { %286 = vst [vmem:[#allocation7] sm:$0xff] %v281_v33 }
 0x1ca   :  { %v283_v35 = vpop.f32.mrf.mxu1 }
 0x1cb   :  { %493 = shalt.err (!%p490_p5)
}
 0x1cc   :  { %296 = dma.vmem_to_hbm [thread:$0]  %s294_s17, 128, %s579_s5, [#allocation4]   ;;  %v393_v36 = vpop.f32.mrf.mxu1 }
 0x1cd   :  { %506 = dma.done.wait [#allocation4], 128  }
 0x1ce   :  { %507 = vsyncadd [#allocation4], 4294967168 }
 0x1cf   :  { %508 = dma.done.wait [#allocation9], 128  }
 0x1d0   :  { %509 = vsyncadd [#allocation9], 4294967168 }
 0x1d1   :  { %313 = vsyncpa [#allocation3], 1 }
 0x1d2   :  { %314 = vsyncpa [#allocation6], 1 }
 0x1d3   :  { %315 = vsyncpa [#allocation4], 1 }
 0x1d4   :  { %316 = vsyncpa [#allocation9], 1 }

</bundles_post_ra>
